<compile_context>
chip_gen: v5e
topology: v5e:2x2
jax: 0.10.0
libtpu: 0.0.40
codegen_flags: <defaults>
</compile_context>

<pallas_src>
import functools
import math

import jax
import jax.numpy as jnp
from jax.experimental import pallas as pl
from jax.experimental.pallas import tpu as pltpu


def qagent_fused_kernel(x_ref, w1_ref, b1_ref, w2_ref, b2_ref, out_ref, *,
                        n_out, num_gen):
    # hidden = tanh(x @ W1 + b1)   (MXU matmul, VPU add, EUP tanh)
    h = jnp.tanh(
        jnp.dot(x_ref[...], w1_ref[...], preferred_element_type=jnp.float32)
        + b1_ref[...]
    )
    # One lane-padded output matmul:
    #   lanes [0, n_out)              -> Q-values (h @ W2 + b2)
    #   lanes [n_out, n_out+num_gen)  -> q_on - q_off margin per generator
    #   remaining lanes               -> zero padding
    q = (
        jnp.dot(h, w2_ref[...], preferred_element_type=jnp.float32)
        + b2_ref[...]
    )
    # Threshold the margin lanes to 0/1 action bits in-place (cheap VPU work).
    lane = jax.lax.broadcasted_iota(jnp.int32, q.shape, 1)
    is_act_lane = (lane >= n_out) & (lane < n_out + num_gen)
    out_ref[...] = jnp.where(is_act_lane, (q > 0.0).astype(jnp.float32), q)


def qagent_forward(x, w1, b1, w2, b2, *, block_b=4096):
    """x: [B, obs_size] f32 -> (q: [B, 2*num_gen] f32, actions: [B, num_gen] i32).

    block_b controls the batch tile: default covers the whole batch in one grid
    step (best on 1-TC v5e/v6e); for v7x pass block_b ~= B/2 to give each of
    the two TensorCores exactly one step.
    """
    B, obs_size = x.shape
    hidden = w1.shape[1]
    n_out = w2.shape[1]
    num_gen = n_out // 2

    # Lane-dense padded output width; guard against silently dropping lanes.
    n_pad = max(128, ((n_out + num_gen + 127) // 128) * 128)
    assert n_out + num_gen <= n_pad

    # Pad the tiny output layer to n_pad lanes once (wrapper-side, resident):
    #   [:, :n_out]              = W2
    #   [:, n_out:n_out+num_gen] = W2_odd - W2_even   (greedy-action margin)
    w2p = jnp.zeros((hidden, n_pad), jnp.float32)
    w2p = w2p.at[:, :n_out].set(w2)
    w2p = w2p.at[:, n_out:n_out + num_gen].set(w2[:, 1::2] - w2[:, 0::2])

    b2f = b2.reshape(-1)
    b2p = jnp.zeros((1, n_pad), jnp.float32)
    b2p = b2p.at[:, :n_out].set(b2f.reshape(1, n_out))
    b2p = b2p.at[:, n_out:n_out + num_gen].set(
        (b2f[1::2] - b2f[0::2]).reshape(1, num_gen))

    b1 = b1.reshape(1, hidden)

    # Batch tiling: balanced tiles, 8-row aligned, as few grid steps as possible.
    bp8 = ((B + 7) // 8) * 8
    ntiles = max(1, pl.cdiv(bp8, max(8, block_b)))
    tb = ((pl.cdiv(bp8, ntiles) + 7) // 8) * 8
    Bp = tb * ntiles
    if Bp != B:
        x = jnp.pad(x, ((0, Bp - B), (0, 0)))

    kernel = functools.partial(qagent_fused_kernel, n_out=n_out, num_gen=num_gen)
    out = pl.pallas_call(
        kernel,
        out_shape=jax.ShapeDtypeStruct((Bp, n_pad), jnp.float32),
        grid=(ntiles,),
        in_specs=[
            pl.BlockSpec((tb, obs_size), lambda i: (i, 0)),       # x tile
            pl.BlockSpec((obs_size, hidden), lambda i: (0, 0)),   # W1 (resident)
            pl.BlockSpec((1, hidden), lambda i: (0, 0)),          # b1
            pl.BlockSpec((hidden, n_pad), lambda i: (0, 0)),      # W2 padded (+Wdiff)
            pl.BlockSpec((1, n_pad), lambda i: (0, 0)),           # b2 padded (+bdiff)
        ],
        out_specs=pl.BlockSpec((tb, n_pad), lambda i: (i, 0)),    # fused Q/action slab
        compiler_params=pltpu.CompilerParams(
            dimension_semantics=("parallel",)),
    )(x, w1, b1, w2p, b2p)

    q = out[:B, :n_out]
    actions = out[:B, n_out:n_out + num_gen].astype(jnp.int32)
    return q, actions


def init_linear(key, fan_in, fan_out):
    """Deterministic init matching torch.nn.Linear default (U[-1/sqrt(fan_in), +1/sqrt(fan_in)])."""
    kw, kb = jax.random.split(key)
    bound = 1.0 / math.sqrt(fan_in)
    w = jax.random.uniform(kw, (fan_in, fan_out), jnp.float32, -bound, bound)
    b = jax.random.uniform(kb, (1, fan_out), jnp.float32, -bound, bound)
    return w, b


if __name__ == "__main__":
    # QAgent sizing: num_gen=4 -> n_out=8, num_nodes=32; obs_size is a small
    # flat observation size (gen up/down times + forecast horizon) = 64.
    # TODO(synk): LimitedHorizonProcessor.process (dict -> np.array) is host-side
    # preprocessing outside the network; the kernel starts from the flat obs.
    num_gen = 4
    num_nodes = 32
    n_out = 2 * num_gen
    obs_size = 64
    batch = 8  # small demo batch; wrapper handles arbitrary batch sizes

    key = jax.random.PRNGKey(0)
    k_x, k_l1, k_l2 = jax.random.split(key, 3)

    x = jax.random.normal(k_x, (batch, obs_size), jnp.float32)
    w1, b1 = init_linear(k_l1, obs_size, num_nodes)
    w2, b2 = init_linear(k_l2, num_nodes, n_out)

    q, actions = qagent_forward(x, w1, b1, w2, b2)
    q, actions = jax.block_until_ready((q, actions))

    # Reference check in plain JAX (same math as the PyTorch forward).
    q_ref = jnp.tanh(x @ w1 + b1) @ w2 + b2
    assert q.shape == (batch, n_out)
    assert jnp.allclose(q, q_ref, atol=1e-5, rtol=1e-5)

    # Greedy-action semantics (QAgent.act): argmax over (off, on) per generator.
    act_ref = q_ref.reshape(batch, num_gen, 2).argmax(axis=2).astype(jnp.int32)
    assert actions.shape == (batch, num_gen)
    assert jnp.array_equal(actions, act_ref)

    print("KERNEL_OK")
</pallas_src>

<mosaic_0001>
module attributes {stable_mosaic.version = 11 : i64} {
  func.func @qagent_fused_kernel(%arg0: i32, %arg1: memref<8x64xf32, #tpu.memory_space<vmem>>, %arg2: memref<64x32xf32, #tpu.memory_space<vmem>>, %arg3: memref<1x32xf32, #tpu.memory_space<vmem>>, %arg4: memref<32x128xf32, #tpu.memory_space<vmem>>, %arg5: memref<1x128xf32, #tpu.memory_space<vmem>>, %arg6: memref<8x128xf32, #tpu.memory_space<vmem>>) attributes {dimension_semantics = [#tpu.dimension_semantics<parallel>], iteration_bounds = array<i64: 1>, scalar_prefetch = 0 : i64, scratch_operands = 0 : i64, tpu.core_type = #tpu.core_type<tc>, window_params = [{transform_indices = @transform_0, window_bounds = array<i64: 8, 64>}, {pipeline_mode = #tpu.pipeline_mode<synchronous>, transform_indices = @transform_1, window_bounds = array<i64: 64, 32>}, {pipeline_mode = #tpu.pipeline_mode<synchronous>, transform_indices = @transform_2, window_bounds = array<i64: 1, 32>}, {pipeline_mode = #tpu.pipeline_mode<synchronous>, transform_indices = @transform_3, window_bounds = array<i64: 32, 128>}, {pipeline_mode = #tpu.pipeline_mode<synchronous>, transform_indices = @transform_4, window_bounds = array<i64: 1, 128>}, {transform_indices = @transform_5, window_bounds = array<i64: 8, 128>}]} {
    %c0 = arith.constant 0 : index
    %c0_0 = arith.constant 0 : index
    %0 = vector.load %arg1[%c0, %c0_0] : memref<8x64xf32, #tpu.memory_space<vmem>>, vector<8x64xf32>
    %c0_1 = arith.constant 0 : index
    %c0_2 = arith.constant 0 : index
    %1 = vector.load %arg2[%c0_1, %c0_2] : memref<64x32xf32, #tpu.memory_space<vmem>>, vector<64x32xf32>
    %cst = arith.constant dense<0.000000e+00> : vector<8x32xf32>
    %2 = tpu.matmul %0, %1, %cst {dimension_numbers = #tpu.dot_dimension_numbers<[1], [0], [0], [1], [0, 0, 1, 1], [], []>} : vector<8x64xf32>, vector<64x32xf32>, vector<8x32xf32> -> vector<8x32xf32>
    %c0_3 = arith.constant 0 : index
    %c0_4 = arith.constant 0 : index
    %3 = vector.load %arg3[%c0_3, %c0_4] : memref<1x32xf32, #tpu.memory_space<vmem>>, vector<1x32xf32>
    %4 = vector.broadcast %3 : vector<1x32xf32> to vector<8x32xf32>
    %5 = arith.addf %2, %4 : vector<8x32xf32>
    %6 = math.tanh %5 : vector<8x32xf32>
    %c0_5 = arith.constant 0 : index
    %c0_6 = arith.constant 0 : index
    %7 = vector.load %arg4[%c0_5, %c0_6] : memref<32x128xf32, #tpu.memory_space<vmem>>, vector<32x128xf32>
    %cst_7 = arith.constant dense<0.000000e+00> : vector<8x128xf32>
    %8 = tpu.matmul %6, %7, %cst_7 {dimension_numbers = #tpu.dot_dimension_numbers<[1], [0], [0], [1], [0, 0, 1, 1], [], []>} : vector<8x32xf32>, vector<32x128xf32>, vector<8x128xf32> -> vector<8x128xf32>
    %c0_8 = arith.constant 0 : index
    %c0_9 = arith.constant 0 : index
    %9 = vector.load %arg5[%c0_8, %c0_9] : memref<1x128xf32, #tpu.memory_space<vmem>>, vector<1x128xf32>
    %10 = vector.broadcast %9 : vector<1x128xf32> to vector<8x128xf32>
    %11 = arith.addf %8, %10 : vector<8x128xf32>
    %12 = tpu.iota {dimensions = array<i32: 1>} : vector<8x128xi32>
    %c8_i32 = arith.constant 8 : i32
    %13 = vector.broadcast %c8_i32 : i32 to vector<8x128xi32>
    %14 = arith.cmpi sge, %12, %13 : vector<8x128xi32>
    %c12_i32 = arith.constant 12 : i32
    %15 = vector.broadcast %c12_i32 : i32 to vector<8x128xi32>
    %16 = arith.cmpi slt, %12, %15 : vector<8x128xi32>
    %17 = arith.andi %14, %16 : vector<8x128xi1>
    %cst_10 = arith.constant 0.000000e+00 : f32
    %18 = vector.broadcast %cst_10 : f32 to vector<8x128xf32>
    %19 = arith.cmpf ogt, %11, %18 : vector<8x128xf32>
    %20 = arith.extui %19 : vector<8x128xi1> to vector<8x128xi32>
    %21 = arith.sitofp %20 : vector<8x128xi32> to vector<8x128xf32>
    %22 = arith.select %17, %21, %11 : vector<8x128xi1>, vector<8x128xf32>
    %c0_11 = arith.constant 0 : index
    %c0_12 = arith.constant 0 : index
    %23 = vector.load %arg6[%c0_11, %c0_12] : memref<8x128xf32, #tpu.memory_space<vmem>>, vector<8x128xf32>
    tpu.vector_store %arg6[%c0_11, %c0_12], %22 {strides = array<i32>} : memref<8x128xf32, #tpu.memory_space<vmem>>, vector<8x128xf32>,
    return
  }
  func.func @transform_0(%arg0: i32) -> (i32, i32) {
    %c0_i32 = arith.constant 0 : i32
    %c0_i32_0 = arith.constant 0 : i32
    return %arg0, %c0_i32 : i32, i32
  }
  func.func @transform_1(%arg0: i32) -> (i32, i32) {
    %c0_i32 = arith.constant 0 : i32
    %c0_i32_0 = arith.constant 0 : i32
    %c0_i32_1 = arith.constant 0 : i32
    return %c0_i32, %c0_i32_0 : i32, i32
  }
  func.func @transform_2(%arg0: i32) -> (i32, i32) {
    %c0_i32 = arith.constant 0 : i32
    %c0_i32_0 = arith.constant 0 : i32
    %c0_i32_1 = arith.constant 0 : i32
    return %c0_i32, %c0_i32_0 : i32, i32
  }
  func.func @transform_3(%arg0: i32) -> (i32, i32) {
    %c0_i32 = arith.constant 0 : i32
    %c0_i32_0 = arith.constant 0 : i32
    %c0_i32_1 = arith.constant 0 : i32
    return %c0_i32, %c0_i32_0 : i32, i32
  }
  func.func @transform_4(%arg0: i32) -> (i32, i32) {
    %c0_i32 = arith.constant 0 : i32
    %c0_i32_0 = arith.constant 0 : i32
    %c0_i32_1 = arith.constant 0 : i32
    return %c0_i32, %c0_i32_0 : i32, i32
  }
  func.func @transform_5(%arg0: i32) -> (i32, i32) {
    %c0_i32 = arith.constant 0 : i32
    %c0_i32_0 = arith.constant 0 : i32
    return %arg0, %c0_i32 : i32, i32
  }
}

</mosaic_0001>

<bundles_post_ra>
// kernel: tpu_custom_call.1
= control target key start
LH: loop header
LB: loop body
LE: loop exit
PB: predicated region body
PF: predicated region fallthrough
CT: control target
= control target key end

     0   :  { %s232_s0 = inlined_call_operand.vmem [shape: f32[8,64], index: 0, kind: input, shape index: {}]   ;;  %s233_s1 = inlined_call_operand.vmem [shape: f32[64,32], index: 1, kind: input, shape index: {}]   ;;  %s234_s2 = inlined_call_operand.vmem [shape: f32[1,32], index: 2, kind: input, shape index: {}]   ;;  %s235_s3 = inlined_call_operand.vmem [shape: f32[32,128], index: 3, kind: input, shape index: {}]   ;;  %s236_s4 = inlined_call_operand.vmem [shape: f32[1,128], index: 4, kind: input, shape index: {}]   ;;  %s237_s5 = inlined_call_operand.hbm [shape: f32[8,128], index: 5, kind: output, shape index: {}]  }
   0x1   :  { %v29_v0 = vld [vmem:[%s233_s1 + $0x38] sm:$0xff]  ;;  %v28_v1 = vld [vmem:[%s233_s1 + $0x30] sm:$0xff]  ;;  %v27_v2 = vld [vmem:[%s233_s1 + $0x28] sm:$0xff] }
   0x2   :  { %46 = vmatpush.msra.mxu0 %v29_v0  ;;  %v26_v3 = vld [vmem:[%s233_s1 + $0x20] sm:$0xff] }
   0x4   :  { %47 = vmatpush.msra.mxu0 %v28_v1 }
   0x5   :  { %10 = vsyncpa [#allocation3], 0  ;;  %v25_v4 = vld [vmem:[%s233_s1 + $0x18] sm:$0xff]  ;;  %v24_v5 = vld [vmem:[%s233_s1 + $0x10] sm:$0xff]  ;;  %vm34_vm0 = vcmask 523264   ;;  %vm67_vm1 = vcmask 261120   ;;  %v91_v17 = vlaneseq }
   0x6   :  { %48 = vmatpush.msra.mxu0 %v27_v2  ;;  %v23_v6 = vld [vmem:[%s233_s1 + $0x8] sm:$0xff]  ;;  %v22_v7 = vld [vmem:[%s233_s1] sm:$0xff]  ;;  %v62_v9 = vld [vmem:[%s235_s3 + $0x18] sm:$0xff]  ;;  %s108_s23 = sshll.u32 %s237_s5, 4  ;;  %v153_v22 = vmov 0.0   ;;  %s109_s23 = int_to_ptr.hbm [resolvable:$true] %s108_s23 }
   0x7   :  { %v21_v8 = vld [vmem:[%s232_s0] sm:$0xff]  ;;  %83 = vmatpush.msra.mxu1 %v62_v9  ;;  %v61_v10 = vld [vmem:[%s235_s3 + $0x10] sm:$0xff]  ;;  %v60_v11 = vld [vmem:[%s235_s3 + $0x8] sm:$0xff]  ;;  %v92_v18 = vand.u32 127, %v91_v17 }
   0x8   :  { %49 = vmatpush.msra.mxu0 %v26_v3  ;;  %v59_v12 = vld [vmem:[%s235_s3] sm:$0xff]  ;;  %s152_s3 = smov [#allocation2]  }
   0x9   :  { %84 = vmatpush.msra.mxu1 %v61_v10  ;;  %v122_v13 = vld [vmem:[%s234_s2] ss:$0 sm:$0xff]  ;;  %vm93_vm2 = vcmp.ge.s32.totalorder %v92_v18, 8  ;;  %vm94_vm3 = vcmp.lt.s32.totalorder %v92_v18, 12  ;;  %s106_s21 = sshll.u32 %s152_s3, 4  ;;  %s107_s21 = int_to_ptr.vmem [resolvable:$true] %s106_s21 }
   0xa   :  { %50 = vmatpush.msra.mxu0 %v25_v4  ;;  %v123_v19 = vld [vmem:[%s236_s4] ss:$0 sm:$0xff]  ;;  %vm95_vm4 = vmand %vm93_vm2, %vm94_vm3 }
   0xb   :  { %85 = vmatpush.msra.mxu1 %v60_v11 }
   0xc   :  { %51 = vmatpush.msra.mxu0 %v24_v5 }
   0xd   :  { %86 = vmatpush.msra.mxu1 %v59_v12 }
   0xe   :  { %52 = vmatpush.msra.mxu0 %v23_v6 }
  0x10   :  { %53 = vmatpush.msra.mxu0 %v22_v7 }
  0x11   :  { %117 = vmatmul.msk.f32.vlgmr.msra.gmra.mxu0 %vm34_vm0, %v21_v8 }
  0x8e   :  { %v55_v14 = vpop.f32.mrf.mxu0 }
  0x8f   :  { %v56_v15 = vadd.f32 %v122_v13, %v55_v14 }
  0x91   :  { %124 = vtanh.f32 %v56_v15 }
  0x97   :  { %v125_v16 = vpop.eup %124 }
  0x98   :  { %118 = vmatmul.msk.f32.vlgmr.msra.gmra.mxu1 %vm67_vm1, %v125_v16 }
 0x115   :  { %v88_v20 = vpop.f32.mrf.mxu1 }
 0x116   :  { %v89_v21 = vadd.f32 %v123_v19, %v88_v20 }
 0x118   :  { %vm96_vm5 = vcmp.gt.f32.partialorder %v89_v21, 0.0 }
 0x119   :  { %v119_v23 = vsel %vm96_vm5, 1.0, %v153_v22 }
 0x11a   :  { %v99_v24 = vsel %vm95_vm4, %v119_v23, %v89_v21 }
 0x11b   :  { %100 = vst [vmem:[#allocation2] sm:$0xff] %v99_v24 }
 0x11c   :  { %111 = dma.vmem_to_hbm [thread:$0]  %s107_s21, 128, %s109_s23, [#allocation3]  }
 0x11d   :  { %150 = dma.done.wait [#allocation3], 128  }
 0x11e   :  { %151 = vsyncadd [#allocation3], 4294967168 }
 0x11f   :  { %116 = vsyncpa [#allocation3], 1 }

</bundles_post_ra>
